<compile_context>
chip_gen: v7x
topology: tpu7x:2x2x1
jax: 0.10.0
libtpu: 0.0.40
codegen_flags: <defaults>
</compile_context>

<pallas_src>
import functools
import math

import jax
import jax.numpy as jnp
from jax.experimental import pallas as pl
from jax.experimental.pallas import tpu as pltpu


# --------------------------------------------------------------------------- #
# Kernel
# --------------------------------------------------------------------------- #
def _fused_matvec_kernel(x_ref, w_ref, b_ref, o_ref):
    """One batch tile: out[0, i] = sum_d x[i, d] * w[0, d] + b."""
    x = x_ref[...].astype(jnp.float32)             # cast in vregs (v5e: no bf16 VALU)
    prod = x * w_ref[...]                          # VPU            (tb, D)
    col = jnp.sum(prod, axis=-1, keepdims=True)    # XLU lane-reduce (tb, 1)
    row = jnp.transpose(col) + b_ref[0]            # XLU sublane->lane relayout -> (1, tb)
    o_ref[...] = row.astype(o_ref.dtype)           # lane-dense store


# --------------------------------------------------------------------------- #
# Static tiling / VMEM helpers (all plain Python ints, resolved at trace time)
# --------------------------------------------------------------------------- #
def _cdiv(a, b):
    return -(-a // b)


def _round_up(n, m):
    return ((n + m - 1) // m) * m


@functools.lru_cache(maxsize=None)
def _vmem_limits():
    """(scoped vmem limit to request, byte budget for the streamed x tiles)."""
    cap = 64 * 1024 * 1024                     # conservative default = v7x per-core VMEM
    try:
        info = pltpu.get_tpu_info()
        cap = int(getattr(info, "vmem_capacity_bytes", cap)) or cap
    except Exception:
        pass
    limit = min(max(cap // 2, 16 * 1024 * 1024), 96 * 1024 * 1024)
    budget = (limit * 7) // 10                 # headroom for output buffers / weight row
    return limit, budget


def _derive_block_b(B, D, budget_bytes, override=None):
    """Batch-tile rows: biggest 128-aligned tile fitting the VMEM budget."""
    b_cap = _round_up(B, 128)
    if override is not None:
        return max(128, min(_round_up(int(override), 128), b_cap))
    row_bytes = D * 4                           # budget in f32 terms (conservative)
    # factor 4 ~= double-buffered x stream + in-kernel cast/product temporaries
    tb = (budget_bytes // (4 * row_bytes)) // 128 * 128
    tb = max(128, min(tb, b_cap))
    # Keep each DMA block >= ~2 MiB (amortise ~0.35us/step) but prefer >= 8 grid
    # steps (pipeline overlap + v7x megacore split) before maxing the tile out.
    tb_floor = max(128, ((2 * 1024 * 1024) // row_bytes) // 128 * 128)
    while tb > tb_floor and _cdiv(B, tb) < 8:
        tb = max(tb_floor, (tb // 2) // 128 * 128)
    return tb


# --------------------------------------------------------------------------- #
# Forward pass
# --------------------------------------------------------------------------- #
@functools.partial(jax.jit, static_argnames=("block_b",))
def weak_classifier_forward(x, w1, b1, w2=None, b2=None, *, block_b=None):
    """Forward pass of WeakClassifier.

    x  : [B, D] (any float dtype; streamed in native dtype)
    w1 : [D, H] (stored [in, out], i.e. transposed vs. PyTorch), b1 : [1, H]
    w2 : [H, 1], b2 : [1, 1]
    For the hidden_dim == 0 single-layer model pass w2 = b2 = None; then w1 is
    the [D, 1] output weight and b1 the [1, 1] output bias.
    Returns [B, 1] in x.dtype.
    """
    B, D = x.shape

    # ---- Fold the affine stack on the weights (never on activations) --------
    if w2 is None:                                   # hidden_dim == 0: Linear(D, 1)
        w_eff = jnp.reshape(w1, (1, D))
        b_eff = jnp.reshape(b1, (1,))
    else:                                            # Linear(D, H) -> Linear(H, 1)
        w_eff = jnp.reshape(w1 @ w2, (1, D))
        b_eff = jnp.reshape(b1 @ w2 + b2, (1,))
    w_eff = w_eff.astype(jnp.float32)
    b_eff = b_eff.astype(jnp.float32)

    # ---- Tiling (static, generation-aware) ----------------------------------
    vmem_limit, vmem_budget = _vmem_limits()
    tb = _derive_block_b(B, D, vmem_budget, block_b)
    grid = (_cdiv(B, tb),)
    out_cols = grid[0] * tb                          # >= B; junk tail sliced off below
    # TODO(synk): for very large D (2*tb*D*4 approaching the VMEM budget even at
    # tb=128), add a second "arbitrary" grid axis over D with a small f32
    # accumulator (init/finalize via pl.when) instead of shrinking tb.

    out = pl.pallas_call(
        _fused_matvec_kernel,
        out_shape=jax.ShapeDtypeStruct((1, out_cols), x.dtype),
        grid_spec=pltpu.PrefetchScalarGridSpec(
            num_scalar_prefetch=0,
            grid=grid,
            in_specs=[
                # Streamed batch tiles (double-buffered); ragged edge clipped by
                # Pallas, so no wrapper-side jnp.pad and no extra HBM pass.
                pl.BlockSpec((tb, D), lambda i: (i, 0)),
                # Folded weight row: constant index map -> VMEM resident.
                pl.BlockSpec((1, D), lambda i: (0, 0)),
                # Folded bias scalar in SMEM.
                pl.BlockSpec(memory_space=pltpu.MemorySpace.SMEM),
            ],
            out_specs=pl.BlockSpec((1, tb), lambda i: (0, i)),   # lane-dense row
        ),
        compiler_params=pltpu.CompilerParams(
            dimension_semantics=("parallel",),       # megacore split on v7x
            vmem_limit_bytes=vmem_limit,             # 32 MiB v7x / 64 MiB v5e-v6e
        ),
    )(x, w_eff, b_eff)

    return out[0, :B].reshape(B, 1)


# --------------------------------------------------------------------------- #
# Parameter init mirroring nn.Linear (uniform +/- 1/sqrt(fan_in)), weights [in, out]
# --------------------------------------------------------------------------- #
def init_params(key, input_dim, hidden_dim):
    k1, k2, k3, k4 = jax.random.split(key, 4)
    b_in = 1.0 / math.sqrt(input_dim)
    if hidden_dim == 0:
        w = jax.random.uniform(k1, (input_dim, 1), jnp.float32, -b_in, b_in)
        b = jax.random.uniform(k2, (1, 1), jnp.float32, -b_in, b_in)
        return w, b, None, None
    b_h = 1.0 / math.sqrt(hidden_dim)
    w1 = jax.random.uniform(k1, (input_dim, hidden_dim), jnp.float32, -b_in, b_in)
    b1 = jax.random.uniform(k2, (1, hidden_dim), jnp.float32, -b_in, b_in)
    w2 = jax.random.uniform(k3, (hidden_dim, 1), jnp.float32, -b_h, b_h)
    b2 = jax.random.uniform(k4, (1, 1), jnp.float32, -b_h, b_h)
    return w1, b1, w2, b2


if __name__ == "__main__":
    key = jax.random.PRNGKey(0)

    # --- Two-layer model, lane-aligned batch (default tile derivation) --------
    B, D, H = 512, 128, 12
    k0, k1 = jax.random.split(key)
    x = jax.random.normal(k0, (B, D), dtype=jnp.float32)
    w1, b1, w2, b2 = init_params(k1, D, H)
    out = jax.block_until_ready(weak_classifier_forward(x, w1, b1, w2, b2))
    ref = (x @ w1 + b1) @ w2 + b2
    assert out.shape == (B, 1)
    assert jnp.allclose(out, ref, atol=1e-4, rtol=1e-4), float(jnp.max(jnp.abs(out - ref)))

    # --- Two-layer model, ragged batch (exercises edge-block clipping + grid) -
    Br = 600
    xr = jax.random.normal(jax.random.fold_in(key, 1), (Br, D), dtype=jnp.float32)
    out_r = jax.block_until_ready(
        weak_classifier_forward(xr, w1, b1, w2, b2, block_b=128))
    ref_r = (xr @ w1 + b1) @ w2 + b2
    assert out_r.shape == (Br, 1)
    assert jnp.allclose(out_r, ref_r, atol=1e-4, rtol=1e-4), float(
        jnp.max(jnp.abs(out_r - ref_r)))

    # --- Single-layer model (hidden_dim == 0) ----------------------------------
    w_s, b_s, _, _ = init_params(jax.random.fold_in(key, 2), D, 0)
    out_s = jax.block_until_ready(weak_classifier_forward(x, w_s, b_s))
    ref_s = x @ w_s + b_s
    assert out_s.shape == (B, 1)
    assert jnp.allclose(out_s, ref_s, atol=1e-4, rtol=1e-4), float(
        jnp.max(jnp.abs(out_s - ref_s)))

    print("KERNEL_OK")
</pallas_src>

<mosaic_0001>
module attributes {stable_mosaic.version = 11 : i64} {
  func.func @_fused_matvec_kernel(%arg0: i32, %arg1: memref<512x128xf32, #tpu.memory_space<vmem>>, %arg2: memref<1x128xf32, #tpu.memory_space<vmem>>, %arg3: memref<1xf32, #tpu.memory_space<smem>>, %arg4: memref<1x512xf32, #tpu.memory_space<vmem>>) attributes {dimension_semantics = [#tpu.dimension_semantics<parallel>], iteration_bounds = array<i64: 1>, scalar_prefetch = 0 : i64, scratch_operands = 0 : i64, tpu.core_type = #tpu.core_type<tc>, window_params = [{transform_indices = @transform_0, window_bounds = array<i64: 512, 128>}, {pipeline_mode = #tpu.pipeline_mode<synchronous>, transform_indices = @transform_1, window_bounds = array<i64: 1, 128>}, {transform_indices = @transform_2, window_bounds = array<i64: 1>}, {transform_indices = @transform_3, window_bounds = array<i64: 1, 512>}]} {
    %c0 = arith.constant 0 : index
    %c0_0 = arith.constant 0 : index
    %0 = vector.load %arg1[%c0, %c0_0] : memref<512x128xf32, #tpu.memory_space<vmem>>, vector<512x128xf32>
    %c0_1 = arith.constant 0 : index
    %c0_2 = arith.constant 0 : index
    %1 = vector.load %arg2[%c0_1, %c0_2] : memref<1x128xf32, #tpu.memory_space<vmem>>, vector<1x128xf32>
    %2 = vector.broadcast %1 : vector<1x128xf32> to vector<512x128xf32>
    %3 = arith.mulf %0, %2 : vector<512x128xf32>
    %cst = arith.constant dense<0.000000e+00> : vector<512xf32>
    %4 = vector.multi_reduction <add>, %3, %cst [1] : vector<512x128xf32> to vector<512xf32>
    %5 = vector.shape_cast %4 : vector<512xf32> to vector<512x1xf32>
    %6 = tpu.transpose %5, [1, 0] : vector<512x1xf32> -> vector<1x512xf32>
    %c0_3 = arith.constant 0 : index
    %7 = memref.load %arg3[%c0_3] : memref<1xf32, #tpu.memory_space<smem>>
    %8 = vector.broadcast %7 : f32 to vector<1x512xf32>
    %9 = arith.addf %6, %8 : vector<1x512xf32>
    %c0_4 = arith.constant 0 : index
    %c0_5 = arith.constant 0 : index
    %10 = vector.load %arg4[%c0_4, %c0_5] : memref<1x512xf32, #tpu.memory_space<vmem>>, vector<1x512xf32>
    tpu.vector_store %arg4[%c0_4, %c0_5], %9 {strides = array<i32>} : memref<1x512xf32, #tpu.memory_space<vmem>>, vector<1x512xf32>,
    return
  }
  func.func @transform_0(%arg0: i32) -> (i32, i32) {
    %c0_i32 = arith.constant 0 : i32
    %c0_i32_0 = arith.constant 0 : i32
    return %arg0, %c0_i32 : i32, i32
  }
  func.func @transform_1(%arg0: i32) -> (i32, i32) {
    %c0_i32 = arith.constant 0 : i32
    %c0_i32_0 = arith.constant 0 : i32
    %c0_i32_1 = arith.constant 0 : i32
    return %c0_i32, %c0_i32_0 : i32, i32
  }
  func.func @transform_2(%arg0: i32) -> i32 {
    %c0_i32 = arith.constant 0 : i32
    %c0_i32_0 = arith.constant 0 : i32
    return %c0_i32 : i32
  }
  func.func @transform_3(%arg0: i32) -> (i32, i32) {
    %c0_i32 = arith.constant 0 : i32
    %c0_i32_0 = arith.constant 0 : i32
    return %c0_i32, %arg0 : i32, i32
  }
}

</mosaic_0001>

<bundles_post_ra>
// kernel: weak_classifier_forward.1
= control target key start
LH: loop header
LB: loop body
LE: loop exit
PB: predicated region body
PF: predicated region fallthrough
CT: control target
= control target key end

     0   :  { %9 = vsyncpa [#allocation4], 0  ;;  %s651_s0 = inlined_call_operand.hbm [shape: f32[512,128], index: 0, kind: input, shape index: {}]   ;;  %s652_s1 = inlined_call_operand.vmem [shape: f32[1,128], index: 1, kind: input, shape index: {}]   ;;  %s653_s2 = inlined_call_operand.<no memory space> [shape: f32[1], index: 2, kind: input, shape index: {}]   ;;  %s654_s3 = inlined_call_operand.hbm [shape: f32[1,512], index: 3, kind: output, shape index: {}]  }
   0x1   :  { %10 = vsyncpa [#allocation5], 0  ;;  %s530_s12 = smov [#allocation3]   ;;  %s482_s16 = scalar_lea.hbm %s651_s0, 8192 }
   0x2   :  { %s16_s13 = sshll.u32 %s530_s12, 4  ;;  %p483_p0 = scmp.ne.s32.totalorder %s651_s0, %s482_s16  ;;  %s17_s13 = int_to_ptr.vmem [resolvable:$true] %s16_s13 }
   0x3   :  { %p486_p1 = scmp.lt.u32.totalorder %s482_s16, %s651_s0 }
   0x5   :  { %p488_p2 = pnand %p486_p1, %p483_p0 }
   0x7   :  { %491 = shalt.err (!%p488_p2)
}
   0x8   :  { %s492_s21 = scalar_lea.vmem %s17_s13, 8192  ;;  %p497_p4 = scmp.lt.s32.totalorder %s17_s13, %s17_s13 }
   0x9   :  { %p493_p3 = scmp.ne.s32.totalorder %s17_s13, %s492_s21  ;;  %p498_p5 = scmp.lt.s32.totalorder %s492_s21, %s492_s21 }
   0xb   :  { %p499_p6 = por %p498_p5, %p497_p4 }
   0xd   :  { %p500_p7 = pnand %p499_p6, %p493_p3 }
   0xf   :  { %503 = shalt.err (!%p500_p7)
}
  0x10   :  { %s531_s22 = smov 128   ;;  %s532_s23 = smov 8  }
  0x11   :  { %22 = dma.hbm_to_vmem [thread:$0]  %s651_s0, 8192, %s17_s13, [#allocation4], %s531_s22, %s531_s22, %s532_s23  }
  0x12   :  { %526 = dma.done.wait [#allocation4], 8192  }
  0x13   :  { %527 = vsyncadd [#allocation4], 4294959104  ;;  %v32_v0 = vld [vmem:[#allocation3 + $0x10] sm:$0xff]  ;;  %v570_v1 = vld [vmem:[%s652_s1] ss:$0 sm:$0xff]  ;;  %s534_s28 = smov [#allocation6]  }
  0x14   :  { %v30_v2 = vld [vmem:[#allocation3] sm:$0xff]  ;;  %v103_v3 = vmul.f32 %v570_v1, %v32_v0  ;;  %v33_v5 = vld [vmem:[#allocation3 + $0x18] sm:$0xff]  ;;  %v31_v6 = vld [vmem:[#allocation3 + $0x8] sm:$0xff]  ;;  %s467_s29 = sshll.u32 %s534_s28, 4  ;;  %s468_s29 = int_to_ptr.vmem [resolvable:$true] %s467_s29 }
  0x15   :  { %v101_v4 = vmul.f32 %v570_v1, %v30_v2  ;;  %v104_v7 = vmul.f32 %v570_v1, %v33_v5  ;;  %v102_v8 = vmul.f32 %v570_v1, %v31_v6  ;;  %v35_v9 = vld [vmem:[#allocation3 + $0x28] sm:$0xff]  ;;  %v34_v10 = vld [vmem:[#allocation3 + $0x20] sm:$0xff]  ;;  %v37_v13 = vld [vmem:[#allocation3 + $0x38] sm:$0xff]  ;;  %p509_p9 = scmp.lt.s32.totalorder %s468_s29, %s468_s29 }
  0x16   :  { %169 = vadd.xlane.f32.xlu1 %v103_v3  ;;  %v106_v11 = vmul.f32 %v570_v1, %v35_v9  ;;  %v105_v12 = vmul.f32 %v570_v1, %v34_v10  ;;  %v36_v14 = vld [vmem:[#allocation3 + $0x30] sm:$0xff]  ;;  %v108_v15 = vmul.f32 %v570_v1, %v37_v13  ;;  %v39_v17 = vld [vmem:[#allocation3 + $0x48] sm:$0xff]  ;;  %v38_v18 = vld [vmem:[#allocation3 + $0x40] sm:$0xff] }
  0x17   :  { %165 = vadd.xlane.f32.xlu0 %v101_v4  ;;  %v107_v16 = vmul.f32 %v570_v1, %v36_v14  ;;  %v110_v19 = vmul.f32 %v570_v1, %v39_v17  ;;  %v109_v20 = vmul.f32 %v570_v1, %v38_v18  ;;  %v41_v21 = vld [vmem:[#allocation3 + $0x58] sm:$0xff]  ;;  %v40_v22 = vld [vmem:[#allocation3 + $0x50] sm:$0xff]  ;;  %v43_v25 = vld [vmem:[#allocation3 + $0x68] sm:$0xff] }
  0x18   :  { %v112_v23 = vmul.f32 %v570_v1, %v41_v21  ;;  %v111_v24 = vmul.f32 %v570_v1, %v40_v22  ;;  %v42_v26 = vld [vmem:[#allocation3 + $0x60] sm:$0xff]  ;;  %v114_v27 = vmul.f32 %v570_v1, %v43_v25  ;;  %v45_v29 = vld [vmem:[#allocation3 + $0x78] sm:$0xff]  ;;  %v44_v30 = vld [vmem:[#allocation3 + $0x70] sm:$0xff] }
  0x19   :  { %v113_v28 = vmul.f32 %v570_v1, %v42_v26  ;;  %v116_v31 = vmul.f32 %v570_v1, %v45_v29  ;;  %v115_v32 = vmul.f32 %v570_v1, %v44_v30  ;;  %v47_v33 = vld [vmem:[#allocation3 + $0x88] sm:$0xff]  ;;  %v46_v34 = vld [vmem:[#allocation3 + $0x80] sm:$0xff]  ;;  %v49_v37 = vld [vmem:[#allocation3 + $0x98] sm:$0xff] }
  0x1a   :  { %171 = vadd.xlane.f32.xlu1 %v104_v7  ;;  %v118_v35 = vmul.f32 %v570_v1, %v47_v33  ;;  %v117_v36 = vmul.f32 %v570_v1, %v46_v34  ;;  %v48_v38 = vld [vmem:[#allocation3 + $0x90] sm:$0xff]  ;;  %v120_v39 = vmul.f32 %v570_v1, %v49_v37  ;;  %v51_v41 = vld [vmem:[#allocation3 + $0xa8] sm:$0xff]  ;;  %v50_v42 = vld [vmem:[#allocation3 + $0xa0] sm:$0xff] }
  0x1b   :  { %167 = vadd.xlane.f32.xlu0 %v102_v8  ;;  %v119_v40 = vmul.f32 %v570_v1, %v48_v38  ;;  %v122_v43 = vmul.f32 %v570_v1, %v51_v41  ;;  %v121_v44 = vmul.f32 %v570_v1, %v50_v42  ;;  %v53_v45 = vld [vmem:[#allocation3 + $0xb8] sm:$0xff]  ;;  %v52_v46 = vld [vmem:[#allocation3 + $0xb0] sm:$0xff]  ;;  %v55_v49 = vld [vmem:[#allocation3 + $0xc8] sm:$0xff] }
  0x1c   :  { %v124_v47 = vmul.f32 %v570_v1, %v53_v45  ;;  %v123_v48 = vmul.f32 %v570_v1, %v52_v46  ;;  %v54_v50 = vld [vmem:[#allocation3 + $0xc0] sm:$0xff]  ;;  %v126_v51 = vmul.f32 %v570_v1, %v55_v49  ;;  %v57_v53 = vld [vmem:[#allocation3 + $0xd8] sm:$0xff]  ;;  %v56_v54 = vld [vmem:[#allocation3 + $0xd0] sm:$0xff] }
  0x1d   :  { %v125_v52 = vmul.f32 %v570_v1, %v54_v50  ;;  %v128_v55 = vmul.f32 %v570_v1, %v57_v53  ;;  %v127_v56 = vmul.f32 %v570_v1, %v56_v54  ;;  %v59_v57 = vld [vmem:[#allocation3 + $0xe8] sm:$0xff]  ;;  %v58_v58 = vld [vmem:[#allocation3 + $0xe0] sm:$0xff]  ;;  %v61_v61 = vld [vmem:[#allocation3 + $0xf8] sm:$0xff] }
  0x1e   :  { %175 = vadd.xlane.f32.xlu1 %v106_v11  ;;  %v130_v59 = vmul.f32 %v570_v1, %v59_v57  ;;  %v129_v60 = vmul.f32 %v570_v1, %v58_v58  ;;  %v60_v62 = vld [vmem:[#allocation3 + $0xf0] sm:$0xff]  ;;  %v132_v63 = vmul.f32 %v570_v1, %v61_v61  ;;  %v63_v2 = vld [vmem:[#allocation3 + $0x108] sm:$0xff]  ;;  %v62_v3 = vld [vmem:[#allocation3 + $0x100] sm:$0xff] }
  0x1f   :  { %173 = vadd.xlane.f32.xlu0 %v105_v12  ;;  %v131_v0 = vmul.f32 %v570_v1, %v60_v62  ;;  %v134_v4 = vmul.f32 %v570_v1, %v63_v2  ;;  %v133_v5 = vmul.f32 %v570_v1, %v62_v3  ;;  %v65_v6 = vld [vmem:[#allocation3 + $0x118] sm:$0xff]  ;;  %v64_v7 = vld [vmem:[#allocation3 + $0x110] sm:$0xff]  ;;  %v67_v10 = vld [vmem:[#allocation3 + $0x128] sm:$0xff] }
  0x20   :  { %v136_v8 = vmul.f32 %v570_v1, %v65_v6  ;;  %v135_v9 = vmul.f32 %v570_v1, %v64_v7  ;;  %v66_v11 = vld [vmem:[#allocation3 + $0x120] sm:$0xff]  ;;  %v138_v12 = vmul.f32 %v570_v1, %v67_v10  ;;  %v69_v14 = vld [vmem:[#allocation3 + $0x138] sm:$0xff]  ;;  %v71_v18 = vld [vmem:[#allocation3 + $0x148] sm:$0xff] }
  0x21   :  { %v137_v13 = vmul.f32 %v570_v1, %v66_v11  ;;  %v73_v22 = vld [vmem:[#allocation3 + $0x158] sm:$0xff]  ;;  %v75_v26 = vld [vmem:[#allocation3 + $0x168] sm:$0xff] }
  0x22   :  { %179 = vadd.xlane.f32.xlu1 %v108_v15  ;;  %v68_v15 = vld [vmem:[#allocation3 + $0x130] sm:$0xff]  ;;  %v77_v30 = vld [vmem:[#allocation3 + $0x178] sm:$0xff]  ;;  %v79_v34 = vld [vmem:[#allocation3 + $0x188] sm:$0xff] }
  0x23   :  { %177 = vadd.xlane.f32.xlu0 %v107_v16  ;;  %v140_v16 = vmul.f32 %v570_v1, %v69_v14  ;;  %v139_v17 = vmul.f32 %v570_v1, %v68_v15  ;;  %v81_v38 = vld [vmem:[#allocation3 + $0x198] sm:$0xff]  ;;  %v83_v42 = vld [vmem:[#allocation3 + $0x1a8] sm:$0xff] }
  0x24   :  { %v85_v46 = vld [vmem:[#allocation3 + $0x1b8] sm:$0xff]  ;;  %v87_v50 = vld [vmem:[#allocation3 + $0x1c8] sm:$0xff] }
  0x25   :  { %v89_v54 = vld [vmem:[#allocation3 + $0x1d8] sm:$0xff]  ;;  %v91_v58 = vld [vmem:[#allocation3 + $0x1e8] sm:$0xff] }
  0x26   :  { %183 = vadd.xlane.f32.xlu1 %v110_v19  ;;  %v70_v19 = vld [vmem:[#allocation3 + $0x140] sm:$0xff]  ;;  %v93_v62 = vld [vmem:[#allocation3 + $0x1f8] sm:$0xff] }
  0x27   :  { %181 = vadd.xlane.f32.xlu0 %v109_v20  ;;  %v142_v20 = vmul.f32 %v570_v1, %v71_v18  ;;  %v141_v21 = vmul.f32 %v570_v1, %v70_v19 }
  0x2a   :  { %187 = vadd.xlane.f32.xlu1 %v112_v23  ;;  %v72_v23 = vld [vmem:[#allocation3 + $0x150] sm:$0xff] }
  0x2b   :  { %185 = vadd.xlane.f32.xlu0 %v111_v24  ;;  %v144_v24 = vmul.f32 %v570_v1, %v73_v22  ;;  %v143_v25 = vmul.f32 %v570_v1, %v72_v23 }
  0x2e   :  { %191 = vadd.xlane.f32.xlu1 %v114_v27  ;;  %v74_v27 = vld [vmem:[#allocation3 + $0x160] sm:$0xff] }
  0x2f   :  { %189 = vadd.xlane.f32.xlu0 %v113_v28  ;;  %v146_v28 = vmul.f32 %v570_v1, %v75_v26  ;;  %v145_v29 = vmul.f32 %v570_v1, %v74_v27 }
  0x32   :  { %195 = vadd.xlane.f32.xlu1 %v116_v31  ;;  %v76_v31 = vld [vmem:[#allocation3 + $0x170] sm:$0xff] }
  0x33   :  { %193 = vadd.xlane.f32.xlu0 %v115_v32  ;;  %v148_v32 = vmul.f32 %v570_v1, %v77_v30  ;;  %v147_v33 = vmul.f32 %v570_v1, %v76_v31 }
  0x36   :  { %199 = vadd.xlane.f32.xlu1 %v118_v35  ;;  %v78_v35 = vld [vmem:[#allocation3 + $0x180] sm:$0xff] }
  0x37   :  { %197 = vadd.xlane.f32.xlu0 %v117_v36  ;;  %v150_v36 = vmul.f32 %v570_v1, %v79_v34  ;;  %v149_v37 = vmul.f32 %v570_v1, %v78_v35 }
  0x3a   :  { %203 = vadd.xlane.f32.xlu1 %v120_v39  ;;  %v80_v39 = vld [vmem:[#allocation3 + $0x190] sm:$0xff] }
  0x3b   :  { %201 = vadd.xlane.f32.xlu0 %v119_v40  ;;  %v152_v40 = vmul.f32 %v570_v1, %v81_v38  ;;  %v151_v41 = vmul.f32 %v570_v1, %v80_v39 }
  0x3e   :  { %207 = vadd.xlane.f32.xlu1 %v122_v43  ;;  %v82_v43 = vld [vmem:[#allocation3 + $0x1a0] sm:$0xff] }
  0x3f   :  { %205 = vadd.xlane.f32.xlu0 %v121_v44  ;;  %v154_v44 = vmul.f32 %v570_v1, %v83_v42  ;;  %v153_v45 = vmul.f32 %v570_v1, %v82_v43 }
  0x42   :  { %211 = vadd.xlane.f32.xlu1 %v124_v47  ;;  %v84_v47 = vld [vmem:[#allocation3 + $0x1b0] sm:$0xff] }
  0x43   :  { %209 = vadd.xlane.f32.xlu0 %v123_v48  ;;  %v156_v48 = vmul.f32 %v570_v1, %v85_v46  ;;  %v155_v49 = vmul.f32 %v570_v1, %v84_v47 }
  0x46   :  { %215 = vadd.xlane.f32.xlu1 %v126_v51  ;;  %v86_v51 = vld [vmem:[#allocation3 + $0x1c0] sm:$0xff] }
  0x47   :  { %213 = vadd.xlane.f32.xlu0 %v125_v52  ;;  %v158_v52 = vmul.f32 %v570_v1, %v87_v50  ;;  %v157_v53 = vmul.f32 %v570_v1, %v86_v51 }
  0x4a   :  { %219 = vadd.xlane.f32.xlu1 %v128_v55  ;;  %v88_v55 = vld [vmem:[#allocation3 + $0x1d0] sm:$0xff] }
  0x4b   :  { %217 = vadd.xlane.f32.xlu0 %v127_v56  ;;  %v160_v56 = vmul.f32 %v570_v1, %v89_v54  ;;  %v159_v57 = vmul.f32 %v570_v1, %v88_v55 }
  0x4e   :  { %223 = vadd.xlane.f32.xlu1 %v130_v59  ;;  %v90_v59 = vld [vmem:[#allocation3 + $0x1e0] sm:$0xff] }
  0x4f   :  { %221 = vadd.xlane.f32.xlu0 %v129_v60  ;;  %v162_v60 = vmul.f32 %v570_v1, %v91_v58  ;;  %v161_v61 = vmul.f32 %v570_v1, %v90_v59 }
  0x52   :  { %227 = vadd.xlane.f32.xlu1 %v132_v63  ;;  %v92_v63 = vld [vmem:[#allocation3 + $0x1f0] sm:$0xff] }
  0x53   :  { %225 = vadd.xlane.f32.xlu0 %v131_v0  ;;  %v164_v0 = vmul.f32 %v570_v1, %v93_v62  ;;  %v163_v2 = vmul.f32 %v570_v1, %v92_v63 }
  0x56   :  { %231 = vadd.xlane.f32.xlu1 %v134_v4 }
  0x57   :  { %229 = vadd.xlane.f32.xlu0 %v133_v5 }
  0x5a   :  { %235 = vadd.xlane.f32.xlu1 %v136_v8 }
  0x5b   :  { %233 = vadd.xlane.f32.xlu0 %v135_v9 }
  0x5e   :  { %239 = vadd.xlane.f32.xlu1 %v138_v12 }
  0x5f   :  { %237 = vadd.xlane.f32.xlu0 %v137_v13 }
  0x62   :  { %243 = vadd.xlane.f32.xlu1 %v140_v16 }
  0x63   :  { %241 = vadd.xlane.f32.xlu0 %v139_v17 }
  0x66   :  { %247 = vadd.xlane.f32.xlu1 %v142_v20 }
  0x67   :  { %245 = vadd.xlane.f32.xlu0 %v141_v21 }
  0x6a   :  { %251 = vadd.xlane.f32.xlu1 %v144_v24 }
  0x6b   :  { %249 = vadd.xlane.f32.xlu0 %v143_v25 }
  0x6e   :  { %255 = vadd.xlane.f32.xlu1 %v146_v28 }
  0x6f   :  { %253 = vadd.xlane.f32.xlu0 %v145_v29 }
  0x72   :  { %259 = vadd.xlane.f32.xlu1 %v148_v32 }
  0x73   :  { %257 = vadd.xlane.f32.xlu0 %v147_v33 }
  0x76   :  { %263 = vadd.xlane.f32.xlu1 %v150_v36 }
  0x77   :  { %261 = vadd.xlane.f32.xlu0 %v149_v37 }
  0x7a   :  { %267 = vadd.xlane.f32.xlu1 %v152_v40 }
  0x7b   :  { %265 = vadd.xlane.f32.xlu0 %v151_v41 }
  0x7e   :  { %271 = vadd.xlane.f32.xlu1 %v154_v44 }
  0x7f   :  { %269 = vadd.xlane.f32.xlu0 %v153_v45 }
  0x82   :  { %275 = vadd.xlane.f32.xlu1 %v156_v48 }
  0x83   :  { %273 = vadd.xlane.f32.xlu0 %v155_v49 }
  0x86   :  { %279 = vadd.xlane.f32.xlu1 %v158_v52 }
  0x87   :  { %277 = vadd.xlane.f32.xlu0 %v157_v53 }
  0x8a   :  { %283 = vadd.xlane.f32.xlu1 %v160_v56 }
  0x8b   :  { %281 = vadd.xlane.f32.xlu0 %v159_v57 }
  0x8e   :  { %287 = vadd.xlane.f32.xlu1 %v162_v60 }
  0x8f   :  { %285 = vadd.xlane.f32.xlu0 %v161_v61 }
  0x92   :  { %291 = vadd.xlane.f32.xlu1 %v164_v0 }
  0x93   :  { %289 = vadd.xlane.f32.xlu0 %v163_v2 }
  0xa3   :  { %v170_v3 = vpop.xlane.xlu1 %169 }
  0xa4   :  { %v166_v4 = vpop.xlane.xlu0 %165 }
  0xa7   :  { %v172_v5 = vpop.xlane.xlu1 %171 }
  0xa8   :  { %v168_v6 = vpop.xlane.xlu0 %167 }
  0xab   :  { %v176_v7 = vpop.xlane.xlu1 %175 }
  0xac   :  { %v174_v8 = vpop.xlane.xlu0 %173 }
  0xaf   :  { %v180_v9 = vpop.xlane.xlu1 %179 }
  0xb0   :  { %v178_v10 = vpop.xlane.xlu0 %177 }
  0xb3   :  { %v184_v11 = vpop.xlane.xlu1 %183 }
  0xb4   :  { %v182_v12 = vpop.xlane.xlu0 %181 }
  0xb7   :  { %v188_v13 = vpop.xlane.xlu1 %187 }
  0xb8   :  { %v186_v14 = vpop.xlane.xlu0 %185 }
  0xbb   :  { %v192_v15 = vpop.xlane.xlu1 %191 }
  0xbc   :  { %v190_v16 = vpop.xlane.xlu0 %189 }
  0xbf   :  { %v196_v17 = vpop.xlane.xlu1 %195 }
  0xc0   :  { %293 = vxpose.xlu0.b32.start [1/16] (narrow) %v166_v4, 8  ;;  %v194_v18 = vpop.xlane.xlu0 %193  ;;  %v533_v4 = vmov 1966171168  }
  0xc3   :  { %v200_v1 = vpop.xlane.xlu1 %199 }
  0xc4   :  { %294 = vxpose.xlu0.b32.cont [2/16] (narrow) %v168_v6, 8  ;;  %v198_v19 = vpop.xlane.xlu0 %197  ;;  %v436_v6 = vlaneseq }
  0xc5   :  { %325 = vxpose.xlu1.b32.start [1/16] (narrow) %v198_v19, 8 }
  0xc6   :  { %vm458_vm0 = vcmp.lt.s32.totalorder %v436_v6, 512 }
  0xc7   :  { %v204_v20 = vpop.xlane.xlu1 %203 }
  0xc8   :  { %295 = vxpose.xlu0.b32.cont [3/16] (narrow) %v170_v3, 8  ;;  %v202_v21 = vpop.xlane.xlu0 %201 }
  0xc9   :  { %326 = vxpose.xlu1.b32.cont [2/16] (narrow) %v200_v1, 8 }
  0xcb   :  { %v208_v22 = vpop.xlane.xlu1 %207 }
  0xcc   :  { %296 = vxpose.xlu0.b32.cont [4/16] (narrow) %v172_v5, 8  ;;  %v206_v23 = vpop.xlane.xlu0 %205  ;;  %v434_v5 = vunpack.c.l.s4 %v533_v4 }
  0xcd   :  { %327 = vxpose.xlu1.b32.cont [3/16] (narrow) %v202_v21, 8 }
  0xcf   :  { %v212_v24 = vpop.xlane.xlu1 %211 }
  0xd0   :  { %297 = vxpose.xlu0.b32.cont [5/16] (narrow) %v174_v8, 8  ;;  %v210_v25 = vpop.xlane.xlu0 %209 }
  0xd1   :  { %328 = vxpose.xlu1.b32.cont [4/16] (narrow) %v204_v20, 8 }
  0xd3   :  { %v216_v26 = vpop.xlane.xlu1 %215 }
  0xd4   :  { %298 = vxpose.xlu0.b32.cont [6/16] (narrow) %v176_v7, 8  ;;  %v214_v27 = vpop.xlane.xlu0 %213  ;;  %v422_v7 = vstv %s653_s2  ;;  %s504_s2 = scalar_lea.vmem %s468_s29, 64 }
  0xd5   :  { %329 = vxpose.xlu1.b32.cont [5/16] (narrow) %v206_v23, 8  ;;  %p505_p8 = scmp.ne.s32.totalorder %s468_s29, %s504_s2  ;;  %p510_p10 = scmp.lt.s32.totalorder %s504_s2, %s504_s2 }
  0xd7   :  { %v220_v28 = vpop.xlane.xlu1 %219  ;;  %p511_p11 = por %p510_p10, %p509_p9 }
  0xd8   :  { %299 = vxpose.xlu0.b32.cont [7/16] (narrow) %v178_v10, 8  ;;  %v218_v29 = vpop.xlane.xlu0 %217 }
  0xd9   :  { %330 = vxpose.xlu1.b32.cont [6/16] (narrow) %v208_v22, 8  ;;  %p512_p12 = pnand %p511_p11, %p505_p8 }
  0xdb   :  { %v224_v30 = vpop.xlane.xlu1 %223 }
  0xdc   :  { %300 = vxpose.xlu0.b32.cont [8/16] (narrow) %v180_v9, 8  ;;  %v222_v31 = vpop.xlane.xlu0 %221 }
  0xdd   :  { %331 = vxpose.xlu1.b32.cont [7/16] (narrow) %v210_v25, 8 }
  0xdf   :  { %v228_v32 = vpop.xlane.xlu1 %227 }
  0xe0   :  { %301 = vxpose.xlu0.b32.cont [9/16] (narrow) %v182_v12, 8  ;;  %v226_v33 = vpop.xlane.xlu0 %225  ;;  %v437_v12 = vshrl.u32 %v436_v6, 7 }
  0xe1   :  { %332 = vxpose.xlu1.b32.cont [8/16] (narrow) %v212_v24, 8 }
  0xe3   :  { %v232_v34 = vpop.xlane.xlu1 %231 }
  0xe4   :  { %302 = vxpose.xlu0.b32.cont [10/16] (narrow) %v184_v11, 8  ;;  %v230_v35 = vpop.xlane.xlu0 %229  ;;  %v435_v11 = vunpack.c.0.s8 %v434_v5 }
  0xe5   :  { %333 = vxpose.xlu1.b32.cont [9/16] (narrow) %v214_v27, 8 }
  0xe7   :  { %v236_v36 = vpop.xlane.xlu1 %235 }
  0xe8   :  { %303 = vxpose.xlu0.b32.cont [11/16] (narrow) %v186_v14, 8  ;;  %v234_v37 = vpop.xlane.xlu0 %233 }
  0xe9   :  { %334 = vxpose.xlu1.b32.cont [10/16] (narrow) %v216_v26, 8 }
  0xeb   :  { %v240_v38 = vpop.xlane.xlu1 %239 }
  0xec   :  { %304 = vxpose.xlu0.b32.cont [12/16] (narrow) %v188_v13, 8  ;;  %v238_v39 = vpop.xlane.xlu0 %237 }
  0xed   :  { %335 = vxpose.xlu1.b32.cont [11/16] (narrow) %v218_v29, 8 }
  0xef   :  { %v244_v40 = vpop.xlane.xlu1 %243 }
  0xf0   :  { %305 = vxpose.xlu0.b32.cont [13/16] (narrow) %v190_v16, 8  ;;  %v242_v41 = vpop.xlane.xlu0 %241  ;;  %v438_v16 = vsub.s32 %v435_v11, %v437_v12 }
  0xf1   :  { %336 = vxpose.xlu1.b32.cont [12/16] (narrow) %v220_v28, 8 }
  0xf3   :  { %v248_v42 = vpop.xlane.xlu1 %247 }
  0xf4   :  { %306 = vxpose.xlu0.b32.cont [14/16] (narrow) %v192_v15, 8  ;;  %v246_v43 = vpop.xlane.xlu0 %245 }
  0xf5   :  { %337 = vxpose.xlu1.b32.cont [13/16] (narrow) %v222_v31, 8 }
  0xf7   :  { %v252_v44 = vpop.xlane.xlu1 %251 }
  0xf8   :  { %307 = vxpose.xlu0.b32.cont [15/16] (narrow) %v194_v18, 8  ;;  %v250_v45 = vpop.xlane.xlu0 %249 }
  0xf9   :  { %338 = vxpose.xlu1.b32.cont [14/16] (narrow) %v224_v30, 8 }
  0xfb   :  { %v256_v47 = vpop.xlane.xlu1 %255 }
  0xfc   :  { %308 = vxpose.xlu0.b32.end [16/16] (narrow) %v196_v17, 8  ;;  %v254_v46 = vpop.xlane.xlu0 %253 }
  0xfd   :  { %339 = vxpose.xlu1.b32.cont [15/16] (narrow) %v226_v33, 8 }
  0xff   :  { %v260_v49 = vpop.xlane.xlu1 %259 }
 0x100   :  { %357 = vxpose.xlu0.b32.start [1/16] (narrow) %v230_v35, 8  ;;  %v258_v48 = vpop.xlane.xlu0 %257 }
 0x101   :  { %340 = vxpose.xlu1.b32.end [16/16] (narrow) %v228_v32, 8 }
 0x103   :  { %v264_v51 = vpop.xlane.xlu1 %263 }
 0x104   :  { %358 = vxpose.xlu0.b32.cont [2/16] (narrow) %v232_v34, 8  ;;  %v262_v50 = vpop.xlane.xlu0 %261 }
 0x105   :  { %389 = vxpose.xlu1.b32.start [1/16] (narrow) %v262_v50, 8 }
 0x107   :  { %v268_v53 = vpop.xlane.xlu1 %267 }
 0x108   :  { %359 = vxpose.xlu0.b32.cont [3/16] (narrow) %v234_v37, 8  ;;  %v266_v52 = vpop.xlane.xlu0 %265 }
 0x109   :  { %390 = vxpose.xlu1.b32.cont [2/16] (narrow) %v264_v51, 8 }
 0x10b   :  { %v272_v55 = vpop.xlane.xlu1 %271 }
 0x10c   :  { %360 = vxpose.xlu0.b32.cont [4/16] (narrow) %v236_v36, 8  ;;  %v270_v54 = vpop.xlane.xlu0 %269 }
 0x10d   :  { %391 = vxpose.xlu1.b32.cont [3/16] (narrow) %v266_v52, 8 }
 0x10f   :  { %v276_v57 = vpop.xlane.xlu1 %275 }
 0x110   :  { %361 = vxpose.xlu0.b32.cont [5/16] (narrow) %v238_v39, 8  ;;  %v274_v56 = vpop.xlane.xlu0 %273 }
 0x111   :  { %392 = vxpose.xlu1.b32.cont [4/16] (narrow) %v268_v53, 8 }
 0x113   :  { %v280_v59 = vpop.xlane.xlu1 %279 }
 0x114   :  { %362 = vxpose.xlu0.b32.cont [6/16] (narrow) %v240_v38, 8  ;;  %v278_v58 = vpop.xlane.xlu0 %277 }
 0x115   :  { %393 = vxpose.xlu1.b32.cont [5/16] (narrow) %v270_v54, 8 }
 0x117   :  { %v284_v61 = vpop.xlane.xlu1 %283 }
 0x118   :  { %363 = vxpose.xlu0.b32.cont [7/16] (narrow) %v242_v41, 8  ;;  %v282_v60 = vpop.xlane.xlu0 %281 }
 0x119   :  { %394 = vxpose.xlu1.b32.cont [6/16] (narrow) %v272_v55, 8 }
 0x11b   :  { %v288_v63 = vpop.xlane.xlu1 %287 }
 0x11c   :  { %364 = vxpose.xlu0.b32.cont [8/16] (narrow) %v244_v40, 8  ;;  %v286_v62 = vpop.xlane.xlu0 %285 }
 0x11d   :  { %395 = vxpose.xlu1.b32.cont [7/16] (narrow) %v274_v56, 8 }
 0x11f   :  { %v292_v2 = vpop.xlane.xlu1 %291 }
 0x120   :  { %365 = vxpose.xlu0.b32.cont [9/16] (narrow) %v246_v43, 8  ;;  %v290_v0 = vpop.xlane.xlu0 %289 }
 0x121   :  { %396 = vxpose.xlu1.b32.cont [8/16] (narrow) %v276_v57, 8 }
 0x124   :  { %366 = vxpose.xlu0.b32.cont [10/16] (narrow) %v248_v42, 8 }
 0x125   :  { %397 = vxpose.xlu1.b32.cont [9/16] (narrow) %v278_v58, 8 }
 0x128   :  { %367 = vxpose.xlu0.b32.cont [11/16] (narrow) %v250_v45, 8 }
 0x129   :  { %398 = vxpose.xlu1.b32.cont [10/16] (narrow) %v280_v59, 8 }
 0x12c   :  { %368 = vxpose.xlu0.b32.cont [12/16] (narrow) %v252_v44, 8 }
 0x12d   :  { %399 = vxpose.xlu1.b32.cont [11/16] (narrow) %v282_v60, 8 }
 0x130   :  { %369 = vxpose.xlu0.b32.cont [13/16] (narrow) %v254_v46, 8 }
 0x131   :  { %400 = vxpose.xlu1.b32.cont [12/16] (narrow) %v284_v61, 8 }
 0x134   :  { %370 = vxpose.xlu0.b32.cont [14/16] (narrow) %v256_v47, 8 }
 0x135   :  { %401 = vxpose.xlu1.b32.cont [13/16] (narrow) %v286_v62, 8 }
 0x138   :  { %371 = vxpose.xlu0.b32.cont [15/16] (narrow) %v258_v48, 8 }
 0x139   :  { %402 = vxpose.xlu1.b32.cont [14/16] (narrow) %v288_v63, 8 }
 0x13c   :  { %372 = vxpose.xlu0.b32.end [16/16] (narrow) %v260_v49, 8 }
 0x13d   :  { %403 = vxpose.xlu1.b32.cont [15/16] (narrow) %v290_v0, 8 }
 0x140   :  { %v309_v3 = vpop.trf.xlu0 }
 0x141   :  { %404 = vxpose.xlu1.b32.end [16/16] (narrow) %v292_v2, 8  ;;  %v423_v13 = vadd.f32 %v422_v7, %v309_v3 }
 0x145   :  { %v341_v8 = vpop.trf.xlu1 }
 0x146   :  { %v424_v10 = vadd.f32 %v422_v7, %v341_v8 }
 0x148   :  { %v431_v17 = vcombine.low %v423_v13, %v424_v10 }
 0x14a   :  { %v439_v19 = vrot.slane %v431_v17, %v438_v16 }
 0x180   :  { %v373_v9 = vpop.trf.xlu0 }
 0x181   :  { %v425_v14 = vadd.f32 %v422_v7, %v373_v9 }
 0x185   :  { %v405_v15 = vpop.trf.xlu1 }
 0x186   :  { %v426_v18 = vadd.f32 %v422_v7, %v405_v15 }
 0x188   :  { %v432_v1 = vcombine.low %v425_v14, %v426_v18 }
 0x18a   :  { %v446_v20 = vrot.slane %v432_v1, %v438_v16 }
 0x18c   :  { %v447_v21 = vcombine.low %v439_v19, %v446_v20 }
 0x18e   :  { %v454_v22 = vrot.slane %v447_v21, %v438_v16 }
 0x190   :  { %460 = vst.msk [vmem:[#allocation6] sm:$0xf] %vm458_vm0, %v454_v22 }
 0x191   :  { %515 = shalt.err (!%p512_p12)
}
 0x192   :  { %s516_s5 = scalar_lea.hbm %s654_s3, 64 }
 0x193   :  { %p517_p13 = scmp.ne.s32.totalorder %s654_s3, %s516_s5  ;;  %p520_p0 = scmp.lt.u32.totalorder %s516_s5, %s654_s3 }
 0x195   :  { %p522_p1 = pnand %p520_p0, %p517_p13 }
 0x197   :  { %525 = shalt.err (!%p522_p1)
}
 0x198   :  { %470 = dma.vmem_to_hbm [thread:$0]  %s468_s29, 64, %s654_s3, [#allocation5]  }
 0x199   :  { %528 = dma.done.wait [#allocation5], 64  }
 0x19a   :  { %529 = vsyncadd [#allocation5], 4294967232 }
 0x19b   :  { %474 = vsyncpa [#allocation4], 1 }
 0x19c   :  { %475 = vsyncpa [#allocation5], 1 }

</bundles_post_ra>
